<compile_context>
chip_gen: v5e
topology: v5e:2x2
jax: 0.10.0
libtpu: 0.0.40
codegen_flags: <defaults>
</compile_context>

<pallas_src>
import jax
import jax.numpy as jnp
from jax.experimental import pallas as pl
from jax.experimental.pallas import tpu as pltpu

# Packed single-step state layout (SMEM, f32[8]):
#   [kp, ki, kd, x, integral, prev_error, out, pad]
_KP, _KI, _KD, _X, _INT, _PREV, _OUT, _PAD = range(8)

# Packed rollout scalar layout (SMEM, f32[8]):
#   [kp, ki, kd, integral0, prev_error0, pad, pad, pad]
_R_KP, _R_KI, _R_KD, _R_INT0, _R_PREV0 = range(5)


# -----------------------------------------------------------------------------
# Single-step kernel (exact module forward; scalar path, SMEM only).
# -----------------------------------------------------------------------------
def _pid_step_kernel(in_ref, out_ref):
    kp = in_ref[_KP]
    ki = in_ref[_KI]
    kd = in_ref[_KD]
    x = in_ref[_X]
    integral = in_ref[_INT]
    prev_error = in_ref[_PREV]

    error = 100.0 - x
    new_integral = integral + error
    out = kp * error + ki * new_integral + kd * (error - prev_error)

    # Write the complete next-step packed state (gains/x passed through) so
    # the caller can feed this buffer straight back in (e.g. under lax.scan).
    out_ref[_KP] = kp
    out_ref[_KI] = ki
    out_ref[_KD] = kd
    out_ref[_X] = x
    out_ref[_INT] = new_integral
    out_ref[_PREV] = error
    out_ref[_OUT] = out
    out_ref[_PAD] = 0.0


def pid_step(state):
    """One PID update on a packed f32[8] state; returns the next packed state."""
    smem = pl.BlockSpec(memory_space=pltpu.MemorySpace.SMEM)
    return pl.pallas_call(
        _pid_step_kernel,
        out_shape=jax.ShapeDtypeStruct((8,), jnp.float32),
        in_specs=[smem],
        out_specs=smem,
    )(state)


def pid_forward(kp, ki, kd, x, integral, prev_error):
    """Functional PIDController.forward for a single step.

    Returns (output, new_integral, new_prev_error), each shape (1,).
    NOTE: for a one-off scalar step, plain jnp under jit is cheaper; this
    exists to match the module as a Pallas kernel.
    """
    s = lambda a: jnp.asarray(a, jnp.float32).reshape(())
    state = jnp.stack([s(kp), s(ki), s(kd), s(x), s(integral), s(prev_error),
                       jnp.float32(0.0), jnp.float32(0.0)])
    new_state = pid_step(state)
    return (new_state[_OUT:_OUT + 1],
            new_state[_INT:_INT + 1],
            new_state[_PREV:_PREV + 1])


# -----------------------------------------------------------------------------
# Trajectory (rollout) kernel: T PID steps in one launch (the real perf win).
# -----------------------------------------------------------------------------
def _pid_rollout_kernel(scal_ref, x_ref, out_ref, integ_ref):
    kp = scal_ref[_R_KP]
    ki = scal_ref[_R_KI]
    kd = scal_ref[_R_KD]
    integral0 = scal_ref[_R_INT0]
    prev_error0 = scal_ref[_R_PREV0]

    x = x_ref[...]                      # (1, T) f32, VMEM
    error = 100.0 - x                   # VPU elementwise
    t = x.shape[-1]

    # Build the prefix-sum and one-step-delay operators in-kernel as 0/1
    # matrices; one MXU pass each replaces the sequential recurrence.
    row = jax.lax.broadcasted_iota(jnp.int32, (t, t), 0)
    col = jax.lax.broadcasted_iota(jnp.int32, (t, t), 1)
    one = jnp.float32(1.0)
    zero = jnp.float32(0.0)
    prefix_mat = jnp.where(row <= col, one, zero)       # inclusive cumsum
    delay_mat = jnp.where(col - row == 1, one, zero)    # shift by one step

    # Broadcast the single trajectory row to a full 8-sublane tile so the
    # matmuls are native (8, T) x (T, T) MXU shapes; keep row 0 of the result.
    err8 = jnp.broadcast_to(error, (8, t))
    csum = jnp.dot(err8, prefix_mat,
                   preferred_element_type=jnp.float32,
                   precision=jax.lax.Precision.HIGHEST)[0:1, :]
    delayed = jnp.dot(err8, delay_mat,
                      preferred_element_type=jnp.float32,
                      precision=jax.lax.Precision.HIGHEST)[0:1, :]

    integral_t = integral0 + csum                       # integral AFTER step t
    lane = jax.lax.broadcasted_iota(jnp.int32, (1, t), 1)
    prev_err_t = jnp.where(lane == 0, prev_error0, delayed)

    # Lane-dense full-width stores (no masked vst).
    out_ref[...] = kp * error + ki * integral_t + kd * (error - prev_err_t)
    integ_ref[...] = integral_t


def pid_rollout(kp, ki, kd, x_traj, integral, prev_error):
    """Run the PID controller over a whole trajectory in one kernel launch.

    Returns (out_traj[T], integral_traj[T], new_integral[1], new_prev_error[1]).
    """
    x_traj = jnp.asarray(x_traj, jnp.float32).reshape(-1)
    t = x_traj.shape[0]
    t_pad = ((t + 127) // 128) * 128
    if t_pad != t:
        # Pad with x=100 -> error=0, which leaves the integral unchanged.
        x_full = jnp.concatenate(
            [x_traj, jnp.full((t_pad - t,), 100.0, jnp.float32)])
    else:
        x_full = x_traj
    # TODO(synk): for very long trajectories, chunk over a grid axis carrying
    # (integral, prev_error) instead of one (T, T) prefix matrix.

    s = lambda a: jnp.asarray(a, jnp.float32).reshape(())
    scal = jnp.stack([s(kp), s(ki), s(kd), s(integral), s(prev_error),
                      jnp.float32(0.0), jnp.float32(0.0), jnp.float32(0.0)])

    smem = pl.BlockSpec(memory_space=pltpu.MemorySpace.SMEM)
    vmem = pl.BlockSpec(memory_space=pltpu.MemorySpace.VMEM)
    out2d, integ2d = pl.pallas_call(
        _pid_rollout_kernel,
        out_shape=(jax.ShapeDtypeStruct((1, t_pad), jnp.float32),
                   jax.ShapeDtypeStruct((1, t_pad), jnp.float32)),
        in_specs=[smem, vmem],
        out_specs=(vmem, vmem),
    )(scal, x_full.reshape(1, t_pad))

    out_traj = out2d.reshape(t_pad)[:t]
    integ_traj = integ2d.reshape(t_pad)[:t]
    new_integral = integ_traj[t - 1:t]
    new_prev_error = 100.0 - x_traj[t - 1:t]
    return out_traj, integ_traj, new_integral, new_prev_error


# -----------------------------------------------------------------------------
# Pure-JAX references.
# -----------------------------------------------------------------------------
def _pid_step_reference(kp, ki, kd, x, integral, prev_error):
    error = 100.0 - x
    new_integral = integral + error
    out = kp * error + ki * new_integral + kd * (error - prev_error)
    return out, new_integral, error


def _pid_rollout_reference(kp, ki, kd, x_traj, integral, prev_error):
    kp, ki, kd = (jnp.asarray(v, jnp.float32).reshape(()) for v in (kp, ki, kd))

    def step(carry, x):
        integ, prev = carry
        error = 100.0 - x
        integ = integ + error
        out = kp * error + ki * integ + kd * (error - prev)
        return (integ, error), (out, integ)

    carry0 = (jnp.asarray(integral, jnp.float32).reshape(()),
              jnp.asarray(prev_error, jnp.float32).reshape(()))
    (fin_int, fin_prev), (outs, integs) = jax.lax.scan(
        step, carry0, jnp.asarray(x_traj, jnp.float32))
    return outs, integs, fin_int.reshape(1), fin_prev.reshape(1)


if __name__ == "__main__":
    key = jax.random.PRNGKey(0)
    k1, k2, k3, k4, k5 = jax.random.split(key, 5)

    kp = jax.random.uniform(k1, (1,), jnp.float32, 0.1, 2.0)
    ki = jax.random.uniform(k2, (1,), jnp.float32, 0.01, 0.5)
    kd = jax.random.uniform(k3, (1,), jnp.float32, 0.01, 0.5)
    x = jax.random.uniform(k4, (1,), jnp.float32, 0.0, 50.0)

    integral0 = jnp.zeros((1,), jnp.float32)
    prev_error0 = jnp.zeros((1,), jnp.float32)

    # --- Single-step forward (matches the PyTorch module's forward). ---
    out, new_int, new_prev = pid_forward(kp, ki, kd, x, integral0, prev_error0)
    jax.block_until_ready((out, new_int, new_prev))
    r_out, r_int, r_prev = _pid_step_reference(kp, ki, kd, x, integral0,
                                               prev_error0)
    assert jnp.allclose(out, r_out, rtol=1e-6, atol=1e-6)
    assert jnp.allclose(new_int, r_int, rtol=1e-6, atol=1e-6)
    assert jnp.allclose(new_prev, r_prev, rtol=1e-6, atol=1e-6)

    # --- Amortized trajectory rollout: T steps in one kernel launch. ---
    T = 128
    x_traj = jax.random.uniform(k5, (T,), jnp.float32, 0.0, 50.0)
    out_traj, integ_traj, fin_int, fin_prev = pid_rollout(
        kp, ki, kd, x_traj, integral0, prev_error0)
    jax.block_until_ready((out_traj, integ_traj, fin_int, fin_prev))

    r_out_traj, r_integ_traj, r_fin_int, r_fin_prev = _pid_rollout_reference(
        kp, ki, kd, x_traj, integral0, prev_error0)
    assert jnp.allclose(out_traj, r_out_traj, rtol=1e-4, atol=1e-2)
    assert jnp.allclose(integ_traj, r_integ_traj, rtol=1e-4, atol=1e-2)
    assert jnp.allclose(fin_int, r_fin_int, rtol=1e-4, atol=1e-2)
    assert jnp.allclose(fin_prev, r_fin_prev, rtol=1e-4, atol=1e-2)

    print("KERNEL_OK")
</pallas_src>

<mosaic_0001>
module attributes {stable_mosaic.version = 11 : i64} {
  func.func @_pid_step_kernel(%arg0: memref<8xf32, #tpu.memory_space<smem>>, %arg1: memref<8xf32, #tpu.memory_space<smem>>) attributes {dimension_semantics = [], scalar_prefetch = 0 : i64, scratch_operands = 0 : i64, tpu.core_type = #tpu.core_type<tc>} {
    %c0 = arith.constant 0 : index
    %0 = memref.load %arg0[%c0] : memref<8xf32, #tpu.memory_space<smem>>
    %c1 = arith.constant 1 : index
    %1 = memref.load %arg0[%c1] : memref<8xf32, #tpu.memory_space<smem>>
    %c2 = arith.constant 2 : index
    %2 = memref.load %arg0[%c2] : memref<8xf32, #tpu.memory_space<smem>>
    %c3 = arith.constant 3 : index
    %3 = memref.load %arg0[%c3] : memref<8xf32, #tpu.memory_space<smem>>
    %c4 = arith.constant 4 : index
    %4 = memref.load %arg0[%c4] : memref<8xf32, #tpu.memory_space<smem>>
    %c5 = arith.constant 5 : index
    %5 = memref.load %arg0[%c5] : memref<8xf32, #tpu.memory_space<smem>>
    %cst = arith.constant 1.000000e+02 : f32
    %6 = arith.subf %cst, %3 : f32
    %7 = arith.addf %4, %6 : f32
    %8 = arith.mulf %0, %6 : f32
    %9 = arith.mulf %1, %7 : f32
    %10 = arith.addf %8, %9 : f32
    %11 = arith.subf %6, %5 : f32
    %12 = arith.mulf %2, %11 : f32
    %13 = arith.addf %10, %12 : f32
    %c0_0 = arith.constant 0 : index
    %14 = memref.load %arg1[%c0_0] : memref<8xf32, #tpu.memory_space<smem>>
    memref.store %0, %arg1[%c0_0] : memref<8xf32, #tpu.memory_space<smem>>
    %c1_1 = arith.constant 1 : index
    %15 = memref.load %arg1[%c1_1] : memref<8xf32, #tpu.memory_space<smem>>
    memref.store %1, %arg1[%c1_1] : memref<8xf32, #tpu.memory_space<smem>>
    %c2_2 = arith.constant 2 : index
    %16 = memref.load %arg1[%c2_2] : memref<8xf32, #tpu.memory_space<smem>>
    memref.store %2, %arg1[%c2_2] : memref<8xf32, #tpu.memory_space<smem>>
    %c3_3 = arith.constant 3 : index
    %17 = memref.load %arg1[%c3_3] : memref<8xf32, #tpu.memory_space<smem>>
    memref.store %3, %arg1[%c3_3] : memref<8xf32, #tpu.memory_space<smem>>
    %c4_4 = arith.constant 4 : index
    %18 = memref.load %arg1[%c4_4] : memref<8xf32, #tpu.memory_space<smem>>
    memref.store %7, %arg1[%c4_4] : memref<8xf32, #tpu.memory_space<smem>>
    %c5_5 = arith.constant 5 : index
    %19 = memref.load %arg1[%c5_5] : memref<8xf32, #tpu.memory_space<smem>>
    memref.store %6, %arg1[%c5_5] : memref<8xf32, #tpu.memory_space<smem>>
    %c6 = arith.constant 6 : index
    %20 = memref.load %arg1[%c6] : memref<8xf32, #tpu.memory_space<smem>>
    memref.store %13, %arg1[%c6] : memref<8xf32, #tpu.memory_space<smem>>
    %cst_6 = arith.constant 0.000000e+00 : f32
    %c7 = arith.constant 7 : index
    %21 = memref.load %arg1[%c7] : memref<8xf32, #tpu.memory_space<smem>>
    memref.store %cst_6, %arg1[%c7] : memref<8xf32, #tpu.memory_space<smem>>
    return
  }
}

</mosaic_0001>

<bundles_post_ra>
// kernel: tpu_custom_call.1
= control target key start
LH: loop header
LB: loop body
LE: loop exit
PB: predicated region body
PF: predicated region fallthrough
CT: control target
= control target key end

     0   :  { %6 = vsyncpa [#allocation3], 0  ;;  %s123_s0 = inlined_call_operand.hbm [shape: f32[8], index: 0, kind: input, shape index: {}]   ;;  %s124_s1 = inlined_call_operand.hbm [shape: f32[8], index: 1, kind: output, shape index: {}]  }
   0x1   :  { %7 = vsyncpa [#allocation4], 0  ;;  %s13_s8 = sshll.u32 %s123_s0, 4  ;;  %s104_s9 = smov [#allocation2]   ;;  %s14_s8 = int_to_ptr.hbm [resolvable:$true] %s13_s8 }
   0x2   :  { %16 = dma.hbm_to_smem %s14_s8, 16, %s104_s9, [#allocation3]  }
   0x3   :  { %100 = dma.done.wait [#allocation3], 16  }
   0x4   :  { %101 = vsyncadd [#allocation3], 4294967280 }
   0x5   :  { %21 = sfence }
   0x6   :  { %s22_s10 = sld [smem:[#allocation2]]  ;;  %s57_s21 = sshll.u32 %s124_s1, 4  ;;  %s58_s21 = int_to_ptr.hbm [resolvable:$true] %s57_s21 }
   0x7   :  { %s68_s11 = sld [smem:[#allocation2 + $0x1]]  ;;  %s105_s25 = smov 0.0  }
   0x8   :  { %s69_s12 = sld [smem:[#allocation2 + $0x2]]  ;;  %s106_s27 = smov [#allocation5]  }
   0x9   :  { %s70_s13 = sld [smem:[#allocation2 + $0x3]] }
   0xa   :  { %s71_s14 = sld [smem:[#allocation2 + $0x4]] }
   0xb   :  { %s72_s15 = sld [smem:[#allocation2 + $0x5]] }
   0xc   :  { %37 = sst [smem:[#allocation5]] %s22_s10 }
   0xd   :  { %39 = sst [smem:[#allocation5 + $0x1]] %s68_s11 }
   0xe   :  { %41 = sst [smem:[#allocation5 + $0x2]] %s69_s12 }
   0xf   :  { %s28_s16 = ssub.f32 100.0, %s70_s13 }
  0x10   :  { %43 = sst [smem:[#allocation5 + $0x3]] %s70_s13 }
  0x11   :  { %s29_s17 = sadd.f32 %s71_s14, %s28_s16  ;;  %s30_s18 = smul.f32 %s28_s16, %s22_s10 }
  0x12   :  { %s33_s0 = ssub.f32 %s28_s16, %s72_s15 }
  0x13   :  { %s31_s22 = smul.f32 %s68_s11, %s29_s17  ;;  %45 = sst [smem:[#allocation5 + $0x4]] %s29_s17 }
  0x14   :  { %s34_s23 = smul.f32 %s69_s12, %s33_s0  ;;  %47 = sst [smem:[#allocation5 + $0x5]] %s28_s16 }
  0x15   :  { %s32_s24 = sadd.f32 %s31_s22, %s30_s18 }
  0x16   :  { %51 = sst [smem:[#allocation5 + $0x7]] %s105_s25 }
  0x17   :  { %s35_s26 = sadd.f32 %s34_s23, %s32_s24 }
  0x19   :  { %49 = sst [smem:[#allocation5 + $0x6]] %s35_s26 }
  0x1a   :  { %60 = dma.smem_to_hbm %s106_s27, 16, %s58_s21, [#allocation4]  }
  0x1b   :  { %102 = dma.done.wait [#allocation4], 16  }
  0x1c   :  { %103 = vsyncadd [#allocation4], 4294967280 }
  0x1d   :  { %65 = sfence }
  0x1e   :  { %66 = vsyncpa [#allocation3], 1 }
  0x1f   :  { %67 = vsyncpa [#allocation4], 1 }

</bundles_post_ra>
